<compile_context>
chip_gen: v6e
topology: v6e:2x2x1
jax: 0.10.0
libtpu: 0.0.40
codegen_flags: <defaults>
</compile_context>

<pallas_src>
import jax
import jax.numpy as jnp
import numpy as np
from jax.experimental import pallas as pl
from jax.experimental.pallas import tpu as pltpu


def _round_up(a, b):
    return (a + b - 1) // b * b


def conv_matmul_bias_kernel(a_ref, w_ref, b_ref, o_ref):
    # a_ref: (tm, Kc)   bf16  im2col rows (one tile of N*H*W output positions)
    # w_ref: (Kc, tn)   bf16  conv weight reshaped to (K*K*Cin, Cout_pad) tile
    # b_ref: (1,  tn)   f32   bias (zero-padded to lane-dense width)
    # o_ref: (tm, tn)   f32   conv + bias output tile
    acc = jnp.dot(a_ref[...], w_ref[...], preferred_element_type=jnp.float32)
    o_ref[...] = (acc + b_ref[...]).astype(o_ref.dtype)


def conv_bias_relu_forward(x_nchw, weight_oihw, bias, kernel_size=3, tile_m=128):
    """x_nchw: (N, Cin, H, W); weight_oihw: (Cout, Cin, K, K); bias: (Cout,). Returns NCHW."""
    N, Cin, H, W = x_nchw.shape
    Cout = weight_oihw.shape[0]
    K = kernel_size
    p = K // 2
    Kc = K * K * Cin

    # ---- wrapper glue: im2col (present the conv as a single lane-dense matmul) ----------
    # TODO(synk): for large Cin/H/W, fold the halo/im2col into the kernel (Element index map
    # or manual halo DMA) to avoid this extra HBM pass; for small Cin this is the reviewed layout.
    x_nhwc = jnp.transpose(x_nchw, (0, 2, 3, 1))                     # (N, H, W, Cin)
    x_pad = jnp.pad(x_nhwc, ((0, 0), (p, p), (p, p), (0, 0)))        # (N, H+2p, W+2p, Cin)
    cols = [x_pad[:, kh:kh + H, kw:kw + W, :]
            for kh in range(K) for kw in range(K)]                   # each (N, H, W, Cin)
    patches = jnp.concatenate(cols, axis=-1).reshape(N * H * W, Kc)  # (M, K*K*Cin), order (kh,kw,ci)

    # weight: OIHW -> (K, K, Cin, Cout) -> (Kc, Cout); ordering matches the patch layout above
    w_mat = jnp.transpose(weight_oihw, (2, 3, 1, 0)).reshape(Kc, Cout)

    # lane-dense output: pad Cout up to a multiple of 128 (unmasked stores); sliced off below
    tn = 128
    Cout_p = _round_up(Cout, tn)
    w_mat = jnp.pad(w_mat, ((0, 0), (0, Cout_p - Cout)))
    b_mat = jnp.pad(bias, (0, Cout_p - Cout)).reshape(1, Cout_p).astype(jnp.float32)

    # row tiling of the im2col matrix = spatial tiling across batch*H*W
    M = N * H * W
    tm = min(tile_m, _round_up(M, 8))
    M_p = _round_up(M, tm)
    patches = jnp.pad(patches, ((0, M_p - M), (0, 0)))

    # bf16 matmul operands, f32 accumulation (v6e/v7x MXU sweet spot; v5e MXU also takes bf16)
    a_bf = patches.astype(jnp.bfloat16)
    w_bf = w_mat.astype(jnp.bfloat16)

    out_mat = pl.pallas_call(
        conv_matmul_bias_kernel,
        out_shape=jax.ShapeDtypeStruct((M_p, Cout_p), jnp.float32),
        grid_spec=pltpu.PrefetchScalarGridSpec(
            num_scalar_prefetch=0,
            grid=(M_p // tm, Cout_p // tn),
            in_specs=[
                pl.BlockSpec((tm, Kc), lambda i, j: (i, 0)),   # im2col rows
                pl.BlockSpec((Kc, tn), lambda i, j: (0, j)),   # weight (constant over i)
                pl.BlockSpec((1, tn), lambda i, j: (0, j)),    # bias
            ],
            out_specs=pl.BlockSpec((tm, tn), lambda i, j: (i, j)),
        ),
        compiler_params=pltpu.CompilerParams(
            dimension_semantics=("parallel", "parallel"),
            vmem_limit_bytes=32 * 1024 * 1024,
        ),
    )(a_bf, w_bf, b_mat)

    out_nhwc = out_mat[:M, :Cout].reshape(N, H, W, Cout)
    # TODO(synk): module's isRelu flag exists but forward() never applies relu -> omitted here.
    return jnp.transpose(out_nhwc, (0, 3, 1, 2)).astype(x_nchw.dtype)   # back to NCHW


def init_params(key, ch_in, ch_out, kernel_size=3):
    # xavier_normal_ on (Cout, Cin, K, K): std = sqrt(2 / (fan_in + fan_out)),
    # fan_in = Cin*K*K, fan_out = Cout*K*K
    fan_in = ch_in * kernel_size * kernel_size
    fan_out = ch_out * kernel_size * kernel_size
    std = float(np.sqrt(2.0 / (fan_in + fan_out)))
    weight = std * jax.random.normal(
        key, (ch_out, ch_in, kernel_size, kernel_size), dtype=jnp.float32)
    bias = jnp.zeros((ch_out,), dtype=jnp.float32)  # CONST0
    return weight, bias


if __name__ == "__main__":
    key = jax.random.PRNGKey(0)
    k_x, k_w = jax.random.split(key)

    N, Cin, H, W = 2, 4, 16, 16
    Cout, K = 16, 3

    x = jax.random.normal(k_x, (N, Cin, H, W), dtype=jnp.float32)
    weight, bias = init_params(k_w, Cin, Cout, K)

    out = conv_bias_relu_forward(x, weight, bias, kernel_size=K)
    out = jax.block_until_ready(out)

    # Reference check against XLA f32 conv (same semantics as F.conv2d + bias broadcast).
    # Tolerance loosened because the kernel uses bf16 matmul operands with f32 accumulation.
    ref = jax.lax.conv_general_dilated(
        x, weight, window_strides=(1, 1), padding="SAME",
        dimension_numbers=("NCHW", "OIHW", "NCHW")) + bias.reshape(1, Cout, 1, 1)
    np.testing.assert_allclose(np.asarray(out), np.asarray(ref), rtol=3e-2, atol=3e-2)

    print("KERNEL_OK")
</pallas_src>

<mosaic_0001>
module attributes {stable_mosaic.version = 11 : i64} {
  func.func @conv_matmul_bias_kernel(%arg0: i32, %arg1: i32, %arg2: memref<128x36xbf16, #tpu.memory_space<vmem>>, %arg3: memref<36x128xbf16, #tpu.memory_space<vmem>>, %arg4: memref<1x128xf32, #tpu.memory_space<vmem>>, %arg5: memref<128x128xf32, #tpu.memory_space<vmem>>) attributes {dimension_semantics = [#tpu.dimension_semantics<parallel>, #tpu.dimension_semantics<parallel>], iteration_bounds = array<i64: 4, 1>, scalar_prefetch = 0 : i64, scratch_operands = 0 : i64, tpu.core_type = #tpu.core_type<tc>, window_params = [{transform_indices = @transform_0, window_bounds = array<i64: 128, 36>}, {transform_indices = @transform_1, window_bounds = array<i64: 36, 128>}, {transform_indices = @transform_2, window_bounds = array<i64: 1, 128>}, {transform_indices = @transform_3, window_bounds = array<i64: 128, 128>}]} {
    %c0 = arith.constant 0 : index
    %c0_0 = arith.constant 0 : index
    %0 = vector.load %arg2[%c0, %c0_0] : memref<128x36xbf16, #tpu.memory_space<vmem>>, vector<128x36xbf16>
    %c0_1 = arith.constant 0 : index
    %c0_2 = arith.constant 0 : index
    %1 = vector.load %arg3[%c0_1, %c0_2] : memref<36x128xbf16, #tpu.memory_space<vmem>>, vector<36x128xbf16>
    %cst = arith.constant dense<0.000000e+00> : vector<128x128xf32>
    %2 = tpu.matmul %0, %1, %cst {dimension_numbers = #tpu.dot_dimension_numbers<[1], [0], [0], [1], [0, 0, 1, 1], [], []>} : vector<128x36xbf16>, vector<36x128xbf16>, vector<128x128xf32> -> vector<128x128xf32>
    %c0_3 = arith.constant 0 : index
    %c0_4 = arith.constant 0 : index
    %3 = vector.load %arg4[%c0_3, %c0_4] : memref<1x128xf32, #tpu.memory_space<vmem>>, vector<1x128xf32>
    %4 = vector.broadcast %3 : vector<1x128xf32> to vector<128x128xf32>
    %5 = arith.addf %2, %4 : vector<128x128xf32>
    %c0_5 = arith.constant 0 : index
    %c0_6 = arith.constant 0 : index
    %6 = vector.load %arg5[%c0_5, %c0_6] : memref<128x128xf32, #tpu.memory_space<vmem>>, vector<128x128xf32>
    tpu.vector_store %arg5[%c0_5, %c0_6], %5 {strides = array<i32>} : memref<128x128xf32, #tpu.memory_space<vmem>>, vector<128x128xf32>,
    return
  }
  func.func @transform_0(%arg0: i32, %arg1: i32) -> (i32, i32) {
    %c0_i32 = arith.constant 0 : i32
    %c0_i32_0 = arith.constant 0 : i32
    return %arg0, %c0_i32 : i32, i32
  }
  func.func @transform_1(%arg0: i32, %arg1: i32) -> (i32, i32) {
    %c0_i32 = arith.constant 0 : i32
    %c0_i32_0 = arith.constant 0 : i32
    return %c0_i32, %arg1 : i32, i32
  }
  func.func @transform_2(%arg0: i32, %arg1: i32) -> (i32, i32) {
    %c0_i32 = arith.constant 0 : i32
    %c0_i32_0 = arith.constant 0 : i32
    return %c0_i32, %arg1 : i32, i32
  }
  func.func @transform_3(%arg0: i32, %arg1: i32) -> (i32, i32) {
    %c0_i32 = arith.constant 0 : i32
    return %arg0, %arg1 : i32, i32
  }
}

</mosaic_0001>

<bundles_post_ra>
// kernel: tpu_custom_call.1
= control target key start
LH: loop header
LB: loop body
LE: loop exit
PB: predicated region body
PF: predicated region fallthrough
CT: control target
= control target key end

     0   :  { %8 = vsyncpa [#allocation3], 0  ;;  %s959_s0 = inlined_call_operand.vmem [shape: bf16[512,36], index: 0, kind: input, shape index: {}]   ;;  %s960_s1 = inlined_call_operand.vmem [shape: bf16[36,128], index: 1, kind: input, shape index: {}]   ;;  %s961_s2 = inlined_call_operand.vmem [shape: f32[1,128], index: 2, kind: input, shape index: {}]   ;;  %s962_s3 = inlined_call_operand.hbm [shape: f32[512,128], index: 3, kind: output, shape index: {}]  }
   0x1   :  { %10 = vsyncpa [#allocation3 + $0x1], 0  ;;  %s803_s12 = smov 0   ;;  %s805_s13 = smov 0  }
   0x2   :  { %s807_s14 = smov 0   ;;  %s809_s15 = smov 0  }
   0x3   :  { %s811_s16 = smov 0   ;;  %s813_s17 = smov 0  }
   0x4 LB: > { %s557_s18 = sadd.s32 4294967295, %s778_s17   ;;  %s558_s19 = sadd.s32 4294967294, %s778_s17   ;;  %s778_s17 = sphi %s813_s17, %s16_s17   ;;  %s774_s16 = sphi %s811_s16, %s969_s16   ;;  %s770_s15 = sphi %s809_s15, %s968_s15   ;;  %s766_s14 = sphi %s807_s14, %s967_s14   ;;  %s762_s13 = sphi %s805_s13, %s966_s13   ;;  %s758_s12 = sphi %s803_s12, %s965_s12  }
   0x5   : > { %s28_s20 = sadd.s32 1, %s774_s16  ;;  %s115_s21 = sadd.s32 1, %s766_s14 }
   0x6   : > { %p30_p0 = scmp.ge.s32.totalorder %s28_s20, 4  ;;  %p125_p1 = scmp.ne.s32.totalorder %s766_s14, %s762_s13 }
   0x7   : > { %p126_p2 = scmp.eq.s32.totalorder %s557_s18, 3  ;;  %p131_p3 = scmp.ne.s32.totalorder %s762_s13, %s758_s12 }
   0x8   : > { %s971_s20 = smov (%p30_p0, %s28_s20), 0  ;;  %p132_p5 = scmp.eq.s32.totalorder %s558_s19, 3 }
   0x9   : > { %p843_p4 = por %p126_p2, %p125_p1  ;;  %s110_s23 = ssub.s32 %s774_s16, %s971_s20 }
   0xa   : > { %p563_p6 = scmp.ge.s32.totalorder %s778_s17, 1  ;;  %p113_p7 = scmp.eq.s32.totalorder %s110_s23, 0 }
   0xb   : > { %p850_p8 = por %p132_p5, %p131_p3  ;;  %p172_p9 = scmp.lt.s32.totalorder %s778_s17, 5 }
   0xc   : > { %s856_s25 = scalar_select %p113_p7, %s766_s14, %s115_s21  }
   0xd   : > { %p173_p10 = pnand %p563_p6, %p172_p9 }
   0xe   : > { %s565_s30 = sshll.u32 (!%p173_p10), %s770_s15, 4  ;;  %s200_s10 = sand.u32 (!%p173_p10), 1, %s762_s13  }
   0xf   : > { %176 = sbr.rel (%p173_p10) target bundleno = 256 (0x100), region = 32  ;;  %p204_p11 = scmp.lt.s32.totalorder (!%p173_p10), %s565_s30, 63 }
  0x10   : > { %s564_s11 = sshll.u32 (!%p173_p10), %s200_s10, 7  ;;  %s592_s23 = sshll.u32 (!%p173_p10), %s770_s15, 11 }
  0x11   : > { %s885_s21 = scalar_lea.vmem (!%p173_p10), [#allocation2], %s564_s11  ;;  %s904_s29 = scalar_lea.hbm (!%p173_p10), %s962_s3, %s592_s23 }
  0x12   : > { %s458_s26 = sshll.u32 (!%p173_p10), %s885_s21, 4  ;;  %s914_s15 = scalar_lea.sflag (!%p173_p10), [#allocation3], %s200_s10  ;;  %s906_s26 = int_to_ptr.vmem [resolvable:$true] %s458_s26 }
  0x13   : > { %s780_s4 = smov (!%p173_p10), [#allocation2]  }
  0x14   : > { %v691_v0 = vld [vmem:[%s960_s1 + $0x10] ss:$0 sps:$4 sm:$0x33]   ;;  %vm326_vm0 = vcmask 1041408   ;;  %v692_v1 = vld [vmem:[%s960_s1 + $0x8] sm:$0xff]   ;;  %v693_v3 = vld [vmem:[%s960_s1] sm:$0xff]  }
  0x15   : > { %632 = vmatprep.subr.msk.bf16.mxu0 %vm326_vm0, %v691_v0  ;;  %633 = vmatprep.subr.msk.bf16.mxu1 %vm326_vm0, %v691_v0  ;;  %v328_v2 = vsel %vm326_vm0, %v691_v0, 0  ;;  %s973_s30 = smov (!%p204_p11, %s565_s30), 63  ;;  %vm301_vm1 = vcmask 293888   ;;  %v567_v12 = vld [vmem:[%s961_s2] ss:$0 sm:$0xff]  ;;  %s706_s5 = sshll.u32 %s780_s4, 4  ;;  %s707_s5 = int_to_ptr.vmem [resolvable:$false] %s706_s5 }
  0x16   : > { %605 = vmatpush3.bf16.msra.mxu0 %v328_v2  ;;  %629 = vmatpush3.bf16.msra.mxu1 %v328_v2  ;;  %s566_s6 = sshll.u32 %s973_s30, 2  ;;  %s702_s30 = scalar_lea.vmem %s906_s26, 2048 }
  0x17   : > { %606 = vmatprep.subr.bf16.mxu0 %v692_v1  ;;  %627 = vmatprep.subr.bf16.mxu1 %v692_v1  ;;  %s207_s9 = scalar_lea.vmem %s959_s0, %s566_s6  ;;  %p703_p12 = scmp.ne.s32.totalorder %s906_s26, %s702_s30 }
  0x18   : > { %v694_v4 = vld [vmem:[%s207_s9] sm:$0xff]   ;;  %v696_v6 = vld [vmem:[%s207_s9 + $0x8] sm:$0xff]   ;;  %v698_v8 = vld [vmem:[%s207_s9 + $0x10] sm:$0xff]   ;;  %s708_s6 = scalar_lea.vmem %s707_s5, 4096  ;;  %p709_p1 = scmp.lt.s32.totalorder %s906_s26, %s707_s5 }
  0x19   : > { %v695_v5 = vld [vmem:[%s207_s9 + $0x20] sm:$0xff]   ;;  %610 = vmatprep.mubr.msk.bf16.mxu0 %vm301_vm1, %v694_v4  ;;  %v697_v7 = vld [vmem:[%s207_s9 + $0x28] sm:$0xff]   ;;  %v699_v9 = vld [vmem:[%s207_s9 + $0x30] sm:$0xff]   ;;  %p704_p13 = pnand %p703_p12, %p843_p4  ;;  %p710_p2 = scmp.lt.s32.totalorder %s708_s6, %s702_s30 }
  0x1a   : > { %607 = vmatpush3.bf16.msra.mxu0 %v692_v1  ;;  %630 = vmatpush3.bf16.msra.mxu1 %v692_v1  ;;  %v700_v10 = vld [vmem:[%s207_s9 + $0x18] sm:$0xff]  }
  0x1b   : > { %608 = vmatprep.subr.bf16.mxu0 %v693_v3  ;;  %628 = vmatprep.subr.bf16.mxu1 %v693_v3  ;;  %v701_v11 = vld [vmem:[%s207_s9 + $0x38] sm:$0xff]   ;;  %p705_p0 = pneg %p704_p13  ;;  %p711_p3 = por %p710_p2, %p709_p1 }
  0x1c   : > { %618 = vmatprep.mubr.msk.bf16.mxu1 %vm301_vm1, %v695_v5 }
  0x1d   : > { %p712_p5 = pnand %p711_p3, %p705_p0 }
  0x1e   : > { %609 = vmatpush3.bf16.msra.mxu0 %v693_v3  ;;  %631 = vmatpush3.bf16.msra.mxu1 %v693_v3 }
  0x21   : > { %611 = vmatmul.mubr.msk.bf16.vlgmr.msra.gmra.mxu0 %vm301_vm1, %v696_v6  ;;  %619 = vmatmul.mubr.msk.bf16.vlgmr.msra.gmra.mxu1 %vm301_vm1, %v697_v7 }
  0x22   : > { %614 = vmatprep.mubr.msk.bf16.mxu0 %vm301_vm1, %v698_v8  ;;  %622 = vmatprep.mubr.msk.bf16.mxu1 %vm301_vm1, %v699_v9 }
  0x29   : > { %615 = vmatmul.mubr.msk.bf16.gmra.mxu0 %vm301_vm1, %v700_v10  ;;  %623 = vmatmul.mubr.msk.bf16.gmra.mxu1 %vm301_vm1, %v701_v11 }
  0xe1   : > { %v612_v13 = vpop.f32.mrf.mxu0  ;;  %v620_v14 = vpop.f32.mrf.mxu1 }
  0xe2   : > { %v373_v15 = vadd.f32 %v612_v13, %v567_v12  ;;  %v405_v16 = vadd.f32 %v620_v14, %v567_v12 }
  0xe3   : > { %v364_v17 = vpop.f32.mrf.mxu0  ;;  %v396_v18 = vpop.f32.mrf.mxu1 }
  0xe4   : > { %429 = vst [vmem:[%s885_s21 + $0x10] sm:$0xff] %v373_v15  ;;  %437 = vst [vmem:[%s885_s21 + $0x50] sm:$0xff] %v405_v16  ;;  %v365_v19 = vadd.f32 %v567_v12, %v364_v17  ;;  %v397_v20 = vadd.f32 %v567_v12, %v396_v18 }
  0xe5   : > { %v613_v21 = vpop.f32.mrf.mxu0  ;;  %v621_v22 = vpop.f32.mrf.mxu1 }
  0xe6   : > { %427 = vst [vmem:[%s885_s21] sm:$0xff] %v365_v19  ;;  %435 = vst [vmem:[%s885_s21 + $0x40] sm:$0xff] %v397_v20  ;;  %v376_v23 = vadd.f32 %v613_v21, %v567_v12  ;;  %v408_v24 = vadd.f32 %v621_v22, %v567_v12 }
  0xe7   : > { %v367_v25 = vpop.f32.mrf.mxu0  ;;  %v399_v26 = vpop.f32.mrf.mxu1 }
  0xe8   : > { %430 = vst [vmem:[%s885_s21 + $0x18] sm:$0xff] %v376_v23  ;;  %438 = vst [vmem:[%s885_s21 + $0x58] sm:$0xff] %v408_v24  ;;  %v368_v27 = vadd.f32 %v567_v12, %v367_v25  ;;  %v400_v28 = vadd.f32 %v567_v12, %v399_v26 }
  0xe9   : > { %v616_v29 = vpop.f32.mrf.mxu0  ;;  %v624_v30 = vpop.f32.mrf.mxu1 }
  0xea   : > { %428 = vst [vmem:[%s885_s21 + $0x8] sm:$0xff] %v368_v27  ;;  %436 = vst [vmem:[%s885_s21 + $0x48] sm:$0xff] %v400_v28  ;;  %v389_v31 = vadd.f32 %v616_v29, %v567_v12  ;;  %v421_v32 = vadd.f32 %v624_v30, %v567_v12 }
  0xeb   : > { %v380_v33 = vpop.f32.mrf.mxu0  ;;  %v412_v34 = vpop.f32.mrf.mxu1 }
  0xec   : > { %433 = vst [vmem:[%s885_s21 + $0x30] sm:$0xff] %v389_v31  ;;  %441 = vst [vmem:[%s885_s21 + $0x70] sm:$0xff] %v421_v32  ;;  %v381_v35 = vadd.f32 %v567_v12, %v380_v33  ;;  %v413_v36 = vadd.f32 %v567_v12, %v412_v34 }
  0xed   : > { %v617_v37 = vpop.f32.mrf.mxu0  ;;  %v625_v38 = vpop.f32.mrf.mxu1 }
  0xee   : > { %431 = vst [vmem:[%s885_s21 + $0x20] sm:$0xff] %v381_v35  ;;  %439 = vst [vmem:[%s885_s21 + $0x60] sm:$0xff] %v413_v36  ;;  %v392_v39 = vadd.f32 %v617_v37, %v567_v12  ;;  %v424_v40 = vadd.f32 %v625_v38, %v567_v12 }
  0xef   : > { %v383_v41 = vpop.f32.mrf.mxu0  ;;  %v415_v42 = vpop.f32.mrf.mxu1 }
  0xf0   : > { %434 = vst [vmem:[%s885_s21 + $0x38] sm:$0xff] %v392_v39  ;;  %442 = vst [vmem:[%s885_s21 + $0x78] sm:$0xff] %v424_v40  ;;  %v384_v43 = vadd.f32 %v567_v12, %v383_v41  ;;  %v416_v44 = vadd.f32 %v567_v12, %v415_v42 }
  0xf2   : > { %432 = vst [vmem:[%s885_s21 + $0x28] sm:$0xff] %v384_v43  ;;  %440 = vst [vmem:[%s885_s21 + $0x68] sm:$0xff] %v416_v44 }
  0xf3   : > { %715 = shalt.err (!%p712_p5)
}
  0xf4   : > { %s716_s7 = scalar_lea.hbm %s904_s29, 2048  ;;  %s720_s10 = scalar_lea.hbm %s962_s3, 8192 }
  0xf5   : > { %p717_p6 = scmp.ne.s32.totalorder %s904_s29, %s716_s7  ;;  %p721_p10 = scmp.lt.s32.totalorder %s904_s29, %s962_s3 }
  0xf6   : > { %p722_p11 = scmp.lt.s32.totalorder %s720_s10, %s716_s7 }
  0xf7   : > { %p718_p7 = pnand %p717_p6, %p843_p4 }
  0xf8   : > { %p723_p12 = por %p722_p11, %p721_p10 }
  0xf9   : > { %p719_p9 = pneg %p718_p7 }
  0xfb   : > { %p724_p13 = pnand %p723_p12, %p719_p9 }
  0xfd   : > { %727 = shalt.err (!%p724_p13)
}
  0xfe   : > { %s781_s19 = smov 128   ;;  %s782_s21 = smov 8  }
  0xff   : > { %634 = dma.vmem_to_hbm [thread:$0]  (%p843_p4), %s906_s26, 2048, %s904_s29, %s914_s15, %s781_s19, %s781_s19, %s782_s21  }
 0x100 PF: > { %p640_p0 = scmp.ge.s32.totalorder %s778_s17, 2  ;;  %s473_s23 = sand.u32 1, %s758_s12  }
 0x101   : > { %s474_s27 = scalar_lea.sflag [#allocation3], %s473_s23 }
 0x102   : > { %p637_p1 = pnand %p640_p0, %p850_p8 }
 0x104   : > { %p638_p2 = pneg %p637_p1 }
 0x106   : > { %753 = dma.done.wait (%p638_p2), %s474_s27, 2048  }
 0x107   : > { %755 = vsyncadd (%p638_p2), %s474_s27, 4294965248  ;;  %s16_s17 = sadd.s32 1, %s778_s17   ;;  %s965_s12 = smov %s762_s13 }
 0x108   : > { %p13_p3 = scmp.ge.s32.totalorder %s16_s17, 6   ;;  %s966_s13 = smov %s766_s14 }
 0x109   : > { %s967_s14 = smov %s856_s25  ;;  %s968_s15 = smov %s774_s16 }
 0x10a   : > { %s969_s16 = smov %s971_s20  ;;  %15 = sbr.rel (!%p13_p3) target bundleno = 4 (0x4), region = 73 }
 0x10f   :  { %479 = vsyncpa [#allocation3], 1 }
 0x110   :  { %481 = vsyncpa [#allocation3 + $0x1], 1 }

</bundles_post_ra>
